<compile_context>
chip_gen: v5e
topology: v5e:2x2
jax: 0.10.0
libtpu: 0.0.40
codegen_flags: <defaults>
</compile_context>

<pallas_src>
import jax
import jax.numpy as jnp
from jax.experimental import pallas as pl
from jax.experimental.pallas import tpu as pltpu


# ---------------------------------------------------------------------------
# Pass 1: feat = relu(W1_sp @ x_sp + W1_cp @ x_cp), plus running spatial sum.
# ---------------------------------------------------------------------------
def _ffm_pass1_kernel(xsp_ref, xcp_ref, w1sp_ref, w1cp_ref, feat_ref, psum_ref):
    # xsp_ref : (1, Csp, T)  bf16      xcp_ref : (1, Ccp, T)  bf16
    # w1sp_ref: (Cout, Csp)  bf16      w1cp_ref: (Cout, Ccp)  bf16
    # feat_ref: (1, Cout, T) bf16      psum_ref: (1, Cout, 1) f32 (resident acc)
    t = pl.program_id(1)

    acc = jnp.dot(w1sp_ref[...], xsp_ref[0], preferred_element_type=jnp.float32)
    acc = acc + jnp.dot(w1cp_ref[...], xcp_ref[0],
                        preferred_element_type=jnp.float32)
    feat = jnp.maximum(acc, 0.0)                       # (Cout, T) f32
    feat_ref[0] = feat.astype(feat_ref.dtype)

    # Running spatial sum for the global average pool (1/HW folded into W2).
    tile_sum = jnp.sum(feat, axis=1, keepdims=True)    # (Cout, 1)

    @pl.when(t == 0)
    def _():
        psum_ref[0] = jnp.zeros_like(psum_ref[0])

    psum_ref[0] += tile_sum


# ---------------------------------------------------------------------------
# Pass 2: out = feat * (1 + sigmoid((W2/HW) @ spatial_sum))
# ---------------------------------------------------------------------------
def _ffm_pass2_kernel(feat_ref, psum_ref, w2_ref, o_ref):
    # feat_ref: (1, Cout, T) bf16      psum_ref: (1, Cout, 1) f32
    # w2_ref  : (Cout, Cout) f32 (already scaled by 1/HW)
    # o_ref   : (1, Cout, T) output dtype
    atten = jnp.dot(w2_ref[...], psum_ref[0],
                    preferred_element_type=jnp.float32)      # (Cout, 1)
    scale = 1.0 + jax.nn.sigmoid(atten)                      # (Cout, 1)
    o_ref[0] = (feat_ref[0].astype(jnp.float32) * scale).astype(o_ref.dtype)


def _pick_spatial_tile(hw, target=1024):
    """Largest multiple-of-128 divisor of hw that is <= target (else hw)."""
    if hw % 128 != 0:
        return hw
    best = 128
    for d in range(128, hw + 1, 128):
        if hw % d == 0 and d <= target:
            best = d
    return best


def feature_fusion_module(fsp, fcp, w1, w2):
    """fsp: (N, Csp, H, W), fcp: (N, Ccp, H, W) float arrays (NCHW).
    w1: (Cout, Csp+Ccp, 1, 1), w2: (Cout, Cout, 1, 1).
    Returns NCHW output matching PyTorch FeatureFusionModule.forward."""
    N, Csp, H, W = fsp.shape
    Ccp = fcp.shape[1]
    Cout = w1.shape[0]
    HW = H * W
    out_dtype = fsp.dtype

    # Free reshapes (no transpose); bf16 for MXU inputs / HBM traffic.
    xsp = fsp.reshape(N, Csp, HW).astype(jnp.bfloat16)
    xcp = fcp.reshape(N, Ccp, HW).astype(jnp.bfloat16)

    w1_mat = w1[:, :, 0, 0]                                   # (Cout, Cin)
    w1_sp = w1_mat[:, :Csp].astype(jnp.bfloat16)              # (Cout, Csp)
    w1_cp = w1_mat[:, Csp:].astype(jnp.bfloat16)              # (Cout, Ccp)
    # Fold the 1/HW of the global average pool into the attention weight.
    w2_scaled = (w2[:, :, 0, 0] / float(HW)).astype(jnp.float32)

    T = _pick_spatial_tile(HW)
    n_tiles = HW // T

    # ---- pass 1: feat tiles + per-image spatial sum -----------------------
    feat, psum = pl.pallas_call(
        _ffm_pass1_kernel,
        grid=(N, n_tiles),
        in_specs=[
            pl.BlockSpec((1, Csp, T), lambda n, t: (n, 0, t)),
            pl.BlockSpec((1, Ccp, T), lambda n, t: (n, 0, t)),
            pl.BlockSpec((Cout, Csp), lambda n, t: (0, 0)),   # resident weight
            pl.BlockSpec((Cout, Ccp), lambda n, t: (0, 0)),   # resident weight
        ],
        out_specs=[
            pl.BlockSpec((1, Cout, T), lambda n, t: (n, 0, t)),
            pl.BlockSpec((1, Cout, 1), lambda n, t: (n, 0, 0)),  # accumulator
        ],
        out_shape=(
            jax.ShapeDtypeStruct((N, Cout, HW), jnp.bfloat16),
            jax.ShapeDtypeStruct((N, Cout, 1), jnp.float32),
        ),
        compiler_params=pltpu.CompilerParams(
            dimension_semantics=("parallel", "arbitrary")),
    )(xsp, xcp, w1_sp, w1_cp)

    # ---- pass 2: fully parallel attention scaling -------------------------
    out = pl.pallas_call(
        _ffm_pass2_kernel,
        grid=(N, n_tiles),
        in_specs=[
            pl.BlockSpec((1, Cout, T), lambda n, t: (n, 0, t)),
            pl.BlockSpec((1, Cout, 1), lambda n, t: (n, 0, 0)),
            pl.BlockSpec((Cout, Cout), lambda n, t: (0, 0)),
        ],
        out_specs=pl.BlockSpec((1, Cout, T), lambda n, t: (n, 0, t)),
        out_shape=jax.ShapeDtypeStruct((N, Cout, HW), out_dtype),
        compiler_params=pltpu.CompilerParams(
            dimension_semantics=("parallel", "parallel")),
    )(feat, psum, w2_scaled)

    # Free reshape back to NCHW (no transpose).
    return out.reshape(N, Cout, H, W)


def _reference(fsp, fcp, w1, w2):
    """Pure-JAX f32 reference for correctness check."""
    fcat = jnp.concatenate([fsp, fcp], axis=1)
    feat = jnp.einsum("nchw,oc->nohw", fcat, w1[:, :, 0, 0])
    feat = jnp.maximum(feat, 0.0)
    atten = jnp.mean(feat, axis=(2, 3), keepdims=True)
    atten = jnp.einsum("nchw,oc->nohw", atten, w2[:, :, 0, 0])
    atten = jax.nn.sigmoid(atten)
    return feat * atten + feat


if __name__ == "__main__":
    key = jax.random.PRNGKey(0)
    k1, k2, k3, k4 = jax.random.split(key, 4)

    # Small shapes: batch=2, fsp/fcp channels=4 each -> in_chan=8, out_chan=4,
    # spatial=16x16 (HW=256 -> a single 256-wide spatial tile).
    N, Csp, Ccp, H, W = 2, 4, 4, 16, 16
    in_chan = Csp + Ccp
    out_chan = 4

    fsp = jax.random.normal(k1, (N, Csp, H, W), dtype=jnp.float32)
    fcp = jax.random.normal(k2, (N, Ccp, H, W), dtype=jnp.float32)

    # Deterministic kaiming_normal-like init (a=1 -> gain=1, std = 1/sqrt(fan_in))
    w1 = jax.random.normal(k3, (out_chan, in_chan, 1, 1), dtype=jnp.float32) / jnp.sqrt(in_chan)
    w2 = jax.random.normal(k4, (out_chan, out_chan, 1, 1), dtype=jnp.float32) / jnp.sqrt(out_chan)

    out = feature_fusion_module(fsp, fcp, w1, w2)
    out = jax.block_until_ready(out)

    ref = _reference(fsp, fcp, w1, w2)
    assert out.shape == (N, out_chan, H, W), out.shape
    # bf16 matmul inputs (f32 accumulation) -> loosened tolerance vs f32 ref.
    assert jnp.allclose(out, ref, atol=5e-2, rtol=5e-2), float(jnp.max(jnp.abs(out - ref)))

    print("KERNEL_OK")
</pallas_src>

<mosaic_0001>
module attributes {stable_mosaic.version = 11 : i64} {
  func.func @_ffm_pass1_kernel(%arg0: i32, %arg1: i32, %arg2: memref<1x4x256xbf16, #tpu.memory_space<vmem>>, %arg3: memref<1x4x256xbf16, #tpu.memory_space<vmem>>, %arg4: memref<4x4xbf16, #tpu.memory_space<vmem>>, %arg5: memref<4x4xbf16, #tpu.memory_space<vmem>>, %arg6: memref<1x4x256xbf16, #tpu.memory_space<vmem>>, %arg7: memref<1x4x1xf32, #tpu.memory_space<vmem>>) attributes {dimension_semantics = [#tpu.dimension_semantics<parallel>, #tpu.dimension_semantics<arbitrary>], iteration_bounds = array<i64: 2, 1>, scalar_prefetch = 0 : i64, scratch_operands = 0 : i64, tpu.core_type = #tpu.core_type<tc>, window_params = [{transform_indices = @transform_0, window_bounds = array<i64: 1, 4, 256>}, {transform_indices = @transform_1, window_bounds = array<i64: 1, 4, 256>}, {pipeline_mode = #tpu.pipeline_mode<synchronous>, transform_indices = @transform_2, window_bounds = array<i64: 4, 4>}, {pipeline_mode = #tpu.pipeline_mode<synchronous>, transform_indices = @transform_3, window_bounds = array<i64: 4, 4>}, {transform_indices = @transform_4, window_bounds = array<i64: 1, 4, 256>}, {transform_indices = @transform_5, window_bounds = array<i64: 1, 4, 1>}]} {
    %c0 = arith.constant 0 : index
    %c0_0 = arith.constant 0 : index
    %0 = vector.load %arg4[%c0, %c0_0] : memref<4x4xbf16, #tpu.memory_space<vmem>>, vector<4x4xbf16>
    %c0_1 = arith.constant 0 : index
    %c0_2 = arith.constant 0 : index
    %c0_3 = arith.constant 0 : index
    %1 = vector.load %arg2[%c0_1, %c0_2, %c0_3] : memref<1x4x256xbf16, #tpu.memory_space<vmem>>, vector<1x4x256xbf16>
    %2 = vector.shape_cast %1 : vector<1x4x256xbf16> to vector<4x256xbf16>
    %cst = arith.constant dense<0.000000e+00> : vector<4x256xf32>
    %3 = tpu.matmul %0, %2, %cst {dimension_numbers = #tpu.dot_dimension_numbers<[1], [0], [0], [1], [0, 0, 1, 1], [], []>} : vector<4x4xbf16>, vector<4x256xbf16>, vector<4x256xf32> -> vector<4x256xf32>
    %c0_4 = arith.constant 0 : index
    %c0_5 = arith.constant 0 : index
    %4 = vector.load %arg5[%c0_4, %c0_5] : memref<4x4xbf16, #tpu.memory_space<vmem>>, vector<4x4xbf16>
    %c0_6 = arith.constant 0 : index
    %c0_7 = arith.constant 0 : index
    %c0_8 = arith.constant 0 : index
    %5 = vector.load %arg3[%c0_6, %c0_7, %c0_8] : memref<1x4x256xbf16, #tpu.memory_space<vmem>>, vector<1x4x256xbf16>
    %6 = vector.shape_cast %5 : vector<1x4x256xbf16> to vector<4x256xbf16>
    %cst_9 = arith.constant dense<0.000000e+00> : vector<4x256xf32>
    %7 = tpu.matmul %4, %6, %cst_9 {dimension_numbers = #tpu.dot_dimension_numbers<[1], [0], [0], [1], [0, 0, 1, 1], [], []>} : vector<4x4xbf16>, vector<4x256xbf16>, vector<4x256xf32> -> vector<4x256xf32>
    %8 = arith.addf %3, %7 : vector<4x256xf32>
    %cst_10 = arith.constant 0.000000e+00 : f32
    %9 = vector.broadcast %cst_10 : f32 to vector<4x256xf32>
    %10 = arith.maximumf %8, %9 : vector<4x256xf32>
    %11 = arith.truncf %10 : vector<4x256xf32> to vector<4x256xbf16>
    %c0_11 = arith.constant 0 : index
    %c0_12 = arith.constant 0 : index
    %c0_13 = arith.constant 0 : index
    %12 = vector.load %arg6[%c0_11, %c0_12, %c0_13] : memref<1x4x256xbf16, #tpu.memory_space<vmem>>, vector<1x4x256xbf16>
    %13 = vector.shape_cast %12 : vector<1x4x256xbf16> to vector<4x256xbf16>
    %14 = vector.shape_cast %11 : vector<4x256xbf16> to vector<1x4x256xbf16>
    tpu.vector_store %arg6[%c0_11, %c0_12, %c0_13], %14 {strides = array<i32>} : memref<1x4x256xbf16, #tpu.memory_space<vmem>>, vector<1x4x256xbf16>,
    %cst_14 = arith.constant dense<0.000000e+00> : vector<4xf32>
    %15 = vector.multi_reduction <add>, %10, %cst_14 [1] : vector<4x256xf32> to vector<4xf32>
    %16 = vector.shape_cast %15 : vector<4xf32> to vector<4x1xf32>
    %c0_i32 = arith.constant 0 : i32
    %17 = arith.cmpi eq, %arg1, %c0_i32 : i32
    %18 = arith.extui %17 : i1 to i32
    %c0_i32_15 = arith.constant 0 : i32
    %19 = arith.cmpi ne, %18, %c0_i32_15 : i32
    scf.if %19 {
      %cst_22 = arith.constant 0.000000e+00 : f32
      %26 = vector.broadcast %cst_22 : f32 to vector<4x1xf32>
      %c0_23 = arith.constant 0 : index
      %c0_24 = arith.constant 0 : index
      %c0_25 = arith.constant 0 : index
      %27 = vector.load %arg7[%c0_23, %c0_24, %c0_25] : memref<1x4x1xf32, #tpu.memory_space<vmem>>, vector<1x4x1xf32>
      %28 = vector.shape_cast %27 : vector<1x4x1xf32> to vector<4x1xf32>
      %29 = vector.shape_cast %26 : vector<4x1xf32> to vector<1x4x1xf32>
      tpu.vector_store %arg7[%c0_23, %c0_24, %c0_25], %29 {strides = array<i32>} : memref<1x4x1xf32, #tpu.memory_space<vmem>>, vector<1x4x1xf32>,
    } else {
    }
    %c0_16 = arith.constant 0 : index
    %c0_17 = arith.constant 0 : index
    %c0_18 = arith.constant 0 : index
    %20 = vector.load %arg7[%c0_16, %c0_17, %c0_18] : memref<1x4x1xf32, #tpu.memory_space<vmem>>, vector<1x4x1xf32>
    %21 = vector.shape_cast %20 : vector<1x4x1xf32> to vector<4x1xf32>
    %22 = arith.addf %21, %16 : vector<4x1xf32>
    %c0_19 = arith.constant 0 : index
    %c0_20 = arith.constant 0 : index
    %c0_21 = arith.constant 0 : index
    %23 = vector.load %arg7[%c0_19, %c0_20, %c0_21] : memref<1x4x1xf32, #tpu.memory_space<vmem>>, vector<1x4x1xf32>
    %24 = vector.shape_cast %23 : vector<1x4x1xf32> to vector<4x1xf32>
    %25 = vector.shape_cast %22 : vector<4x1xf32> to vector<1x4x1xf32>
    tpu.vector_store %arg7[%c0_19, %c0_20, %c0_21], %25 {strides = array<i32>} : memref<1x4x1xf32, #tpu.memory_space<vmem>>, vector<1x4x1xf32>,
    return
  }
  func.func @transform_0(%arg0: i32, %arg1: i32) -> (i32, i32, i32) {
    %c0_i32 = arith.constant 0 : i32
    %c0_i32_0 = arith.constant 0 : i32
    return %arg0, %c0_i32, %arg1 : i32, i32, i32
  }
  func.func @transform_1(%arg0: i32, %arg1: i32) -> (i32, i32, i32) {
    %c0_i32 = arith.constant 0 : i32
    %c0_i32_0 = arith.constant 0 : i32
    return %arg0, %c0_i32, %arg1 : i32, i32, i32
  }
  func.func @transform_2(%arg0: i32, %arg1: i32) -> (i32, i32) {
    %c0_i32 = arith.constant 0 : i32
    %c0_i32_0 = arith.constant 0 : i32
    %c0_i32_1 = arith.constant 0 : i32
    return %c0_i32, %c0_i32_0 : i32, i32
  }
  func.func @transform_3(%arg0: i32, %arg1: i32) -> (i32, i32) {
    %c0_i32 = arith.constant 0 : i32
    %c0_i32_0 = arith.constant 0 : i32
    %c0_i32_1 = arith.constant 0 : i32
    return %c0_i32, %c0_i32_0 : i32, i32
  }
  func.func @transform_4(%arg0: i32, %arg1: i32) -> (i32, i32, i32) {
    %c0_i32 = arith.constant 0 : i32
    %c0_i32_0 = arith.constant 0 : i32
    return %arg0, %c0_i32, %arg1 : i32, i32, i32
  }
  func.func @transform_5(%arg0: i32, %arg1: i32) -> (i32, i32, i32) {
    %c0_i32 = arith.constant 0 : i32
    %c0_i32_0 = arith.constant 0 : i32
    %c0_i32_1 = arith.constant 0 : i32
    return %arg0, %c0_i32, %c0_i32_0 : i32, i32, i32
  }
}

</mosaic_0001>

<bundles_post_ra>
// kernel: tpu_custom_call.1
= control target key start
LH: loop header
LB: loop body
LE: loop exit
PB: predicated region body
PF: predicated region fallthrough
CT: control target
= control target key end

     0   :  { %s1103_s0 = inlined_call_operand.hbm [shape: bf16[2,4,256], index: 0, kind: input, shape index: {}]   ;;  %s1104_s1 = inlined_call_operand.hbm [shape: bf16[2,4,256], index: 1, kind: input, shape index: {}]   ;;  %s1105_s2 = inlined_call_operand.hbm [shape: bf16[4,4], index: 2, kind: input, shape index: {}]   ;;  %s1106_s3 = inlined_call_operand.vmem [shape: bf16[4,4], index: 3, kind: input, shape index: {}]   ;;  %s1107_s4 = inlined_call_operand.hbm [shape: bf16[2,4,256], index: 4, kind: output, shape index: {0}]   ;;  %s1108_s5 = inlined_call_operand.vmem [shape: f32[2,4,1], index: 5, kind: output, shape index: {1}]  }
   0x1   :  { %1113 = sst [smem:[#allocation18_spill]] %s1105_s2 }
   0x2   :  { %11 = vsyncpa [#allocation3], 0 }
   0x3   :  { %13 = vsyncpa [#allocation3 + $0x1], 0 }
   0x4   :  { %14 = vsyncpa [#allocation6], 0 }
   0x5   :  { %16 = vsyncpa [#allocation6 + $0x1], 0 }
   0x6   :  { %17 = vsyncpa [#allocation4], 0 }
   0x7   :  { %19 = vsyncpa [#allocation4 + $0x1], 0  ;;  %s931_s18 = smov 0   ;;  %s933_s19 = smov 0  }
   0x8   :  { %s935_s20 = smov 0   ;;  %s937_s21 = smov 0  }
   0x9   :  { %s939_s22 = smov 0   ;;  %s941_s23 = smov 0  }
   0xa LB: > { %1114 = sst [smem:[#allocation13_spill]] %s877_s18  ;;  %s962_s24 = sadd.s32 4294967295, %s897_s23   ;;  %s897_s23 = sphi %s941_s23, %s25_s23   ;;  %s893_s22 = sphi %s939_s22, %s1129_s22   ;;  %s889_s21 = sphi %s937_s21, %s1128_s21   ;;  %s885_s20 = sphi %s935_s20, %s1132_s20   ;;  %s881_s19 = sphi %s933_s19, %s1131_s19   ;;  %s877_s18 = sphi %s931_s18, %s1130_s18  }
   0xb   : > { %1115 = sst [smem:[#allocation14_spill]] %s893_s22  ;;  %s610_s25 = sadd.s32 4294967294, %s897_s23  }
   0xc   : > { %p59_p0 = scmp.ne.s32.totalorder %s881_s19, %s877_s18  ;;  %p60_p1 = scmp.eq.s32.totalorder %s962_s24, 0 }
   0xd   : > { %p155_p2 = scmp.eq.s32.totalorder %s962_s24, 1  ;;  %p161_p3 = scmp.eq.s32.totalorder %s610_s25, 1 }
   0xe   : > { %p971_p4 = por %p60_p1, %p59_p0  ;;  %p611_p5 = scmp.ge.s32.totalorder %s897_s23, 1 }
   0xf   : > { %p976_p6 = por %p161_p3, %p59_p0  ;;  %p194_p7 = scmp.lt.s32.totalorder %s897_s23, 3 }
  0x10   : > { %s1119_s2 = sld [smem:[#allocation18_spill]]  ;;  %p613_p9 = scmp.ge.s32.totalorder %s897_s23, 2 }
  0x11   : > { %s1117_s27 = scalar_select %p976_p6, 1, 0 }
  0x12   : > { %p984_p8 = pnand %p611_p5, %p194_p7  ;;  %s899_s7 = smov [#allocation7]  }
  0x13   : > { %1118 = sst [smem:[#allocation15_spill]] %s1117_s27  ;;  %s208_s8 = sshll.u32 %s899_s7, 4  ;;  %s209_s8 = int_to_ptr.vmem [resolvable:$true] %s208_s8 }
  0x14   : > { %p648_p10 = pneg %p984_p8  ;;  %s37_s9 = sadd.s32 1, %s893_s22 }
  0x15   : > { %p39_p12 = scmp.ge.s32.totalorder %s37_s9, 2  ;;  %s46_s10 = sadd.s32 1, %s885_s20 }
  0x16   : > { %s206_s30 = sshll.u32 %s1119_s2, 4  ;;  %p649_p11 = pnand %p648_p10, %p60_p1  ;;  %s207_s30 = int_to_ptr.hbm [resolvable:$true] %s206_s30 }
  0x17   : > { %p53_p13 = scmp.ne.s32.totalorder %s885_s20, %s881_s19  ;;  %p54_p0 = scmp.eq.s32.totalorder %s897_s23, 0 }
  0x18   : > { %651 = dma.hbm_to_vmem [thread:$0]  (!%p649_p11), %s207_s30, 32, %s209_s8, [#allocation6]  }
  0x19   : > { %s1134_s9 = smov (%p39_p12, %s37_s9), 0  ;;  %p1000_p3 = por %p54_p0, %p53_p13 }
  0x1a   : > { %1121 = sst [smem:[#allocation16_spill]] %s1134_s9  ;;  %p1006_p5 = por %p155_p2, %p53_p13 }
  0x1b   : > { %s41_s13 = ssub.s32 %s893_s22, %s1134_s9  ;;  %p664_p7 = scmp.lt.s32.totalorder %s897_s23, 2 }
  0x1c   : > { %p44_p10 = scmp.eq.s32.totalorder %s41_s13, 0  ;;  %s222_s14 = sand.u32 1, %s885_s20  }
  0x1d   : > { %s614_s15 = sshll.u32 %s222_s14, 2  ;;  %s635_s17 = sshll.u32 %s893_s22, 2 }
  0x1e   : > { %s1015_s16 = scalar_select %p44_p10, %s885_s20, %s46_s10  }
  0x1f   : > { %s233_s29 = scalar_lea.hbm %s1103_s0, %s635_s17  ;;  %s226_s30 = scalar_lea.vmem [#allocation2], %s614_s15 }
  0x20   : > { %1124 = sst [smem:[#allocation17_spill]] %s1015_s16  ;;  %s237_s7 = sshll.u32 %s226_s30, 4  ;;  %s238_s7 = int_to_ptr.vmem [resolvable:$true] %s237_s7 }
  0x21   : > { %s235_s8 = sshll.u32 %s233_s29, 4  ;;  %p653_p2 = pnand %p664_p7, %p1000_p3  ;;  %s236_s8 = int_to_ptr.hbm [resolvable:$true] %s235_s8 }
  0x22   : > { %s255_s13 = scalar_lea.hbm %s1104_s1, %s635_s17  ;;  %s244_s27 = sand.u32 1, %s897_s23  }
  0x23   : > { %s223_s18 = scalar_lea.sflag [#allocation3], %s222_s14  ;;  %s257_s10 = sshll.u32 %s255_s13, 4  ;;  %s258_s10 = int_to_ptr.hbm [resolvable:$true] %s257_s10 }
  0x24   : > { %655 = dma.hbm_to_vmem [thread:$0]  (!%p653_p2), %s236_s8, 64, %s238_s7, %s223_s18  }
  0x25   : > { %s248_s22 = scalar_lea.vmem [#allocation5], %s614_s15  ;;  %s245_s25 = scalar_lea.sflag [#allocation6], %s244_s27 }
  0x26   : > { %s259_s16 = sshll.u32 %s248_s22, 4  ;;  %268 = sbr.rel (%p984_p8) target bundleno = 328 (0x148), region = 36  ;;  %s260_s16 = int_to_ptr.vmem [resolvable:$true] %s259_s16 }
  0x27   : > { %658 = dma.hbm_to_vmem [thread:$0]  (!%p653_p2), %s258_s10, 64, %s260_s16, %s245_s25  }
  0x28   : > { %s1030_s11 = sand.u32 (!%p984_p8), 1, %s881_s19  }
  0x29   : > { %s1033_s2 = sshll.u32 (!%p984_p8), %s1030_s11, 2  ;;  %s271_s18 = scalar_lea.sflag (!%p984_p8), [#allocation3], %s1030_s11 }
  0x2a   : > { %s274_s9 = scalar_lea.vmem (!%p984_p8), [#allocation2], %s1033_s2 }
  0x2b   : > { %860 = dma.done.wait (%p971_p4), %s271_s18, 64  }
  0x2c   : > { %862 = vsyncadd (%p971_p4), %s271_s18, 4294967232  ;;  %s280_s22 = sand.u32 1, %s962_s24   ;;  %s284_s6 = scalar_lea.vmem [#allocation5], %s1033_s2 }
  0x2d   : > { %s281_s27 = scalar_lea.sflag [#allocation6], %s280_s22 }
  0x2e   : > { %864 = dma.done.wait (%p971_p4), %s281_s27, 64  }
  0x2f   : > { %866 = vsyncadd (%p971_p4), %s281_s27, 4294967232 }
  0x30   : > { %868 = dma.done.wait (%p60_p1), [#allocation6], 32  }
  0x31   : > { %870 = vsyncadd (%p60_p1), [#allocation6], 4294967264  ;;  %v337_v0 = vld [vmem:[%s284_s6] sm:$0xf]  ;;  %vm346_vm0 = vcmask 1041408   ;;  %vm342_vm1 = vcmask 31744  }
  0x32   : > { %339 = vst [vmem:[#allocation1] ss:$4 sm:$0xff] %v337_v0  ;;  %v335_v1 = vld [vmem:[%s274_s9] sm:$0xf]  ;;  %v336_v6 = vld [vmem:[%s1106_s3] sm:$0x3] }
  0x33   : > { %v334_v11 = vld [vmem:[#allocation7] sm:$0x3]  ;;  %s637_s24 = sshll.u32 %s889_s21, 2  ;;  %vm424_vm2 = vcmask 1043456   ;;  %s319_s28 = scalar_lea.vmem [#allocation8], %s1033_s2 }
  0x34   : > { %s458_s17 = scalar_lea.hbm %s1107_s4, %s637_s24  ;;  %s460_s29 = sshll.u32 %s319_s28, 4  ;;  %s461_s29 = int_to_ptr.vmem [resolvable:$true] %s460_s29 }
  0x35   : > { %s462_s30 = sshll.u32 %s458_s17, 4  ;;  %s441_s7 = scalar_lea.sflag [#allocation4], %s1030_s11  ;;  %s463_s30 = int_to_ptr.hbm [resolvable:$true] %s462_s30 }
  0x36   : > { %s821_s8 = sshra.s32 %s463_s30, 4  ;;  %s827_s2 = scalar_lea.hbm %s1107_s4, 8  ;;  %s822_s8 = int_to_ptr.hbm [resolvable:$true] %s821_s8 }
  0x37   : > { %s823_s13 = scalar_lea.hbm %s822_s8, 4  ;;  %p828_p11 = scmp.lt.s32.totalorder %s822_s8, %s1107_s4 }
  0x38   : > { %p824_p1 = scmp.ne.s32.totalorder %s822_s8, %s823_s13  ;;  %p829_p12 = scmp.lt.s32.totalorder %s827_s2, %s823_s13 }
  0x39   : > { %v340_v2 = vld.sshfl [vmem:[#allocation1] sm:$0xff pattern:$0x73625140]  ;;  %v341_v3 = vld.sshfl [vmem:[#allocation1 + $0x8] sm:$0xff pattern:$0x73625140] }
  0x3a   : > { %v347_v4 = vsel %vm346_vm0, %v340_v2, 0  ;;  %v349_v5 = vsel %vm346_vm0, %v341_v3, 0  ;;  %378 = vst [vmem:[#allocation1] ss:$4 sm:$0xff] %v335_v1  ;;  %p825_p4 = pnand %p824_p1, %p1006_p5  ;;  %p830_p13 = por %p829_p12, %p828_p11 }
  0x3b   : > { %358 = vmatpush.bf16.msra.mxu0 %v347_v4  ;;  %371 = vmatpush.bf16.msra.mxu1 %v349_v5 }
  0x3c   : > { %p826_p8 = pneg %p825_p4 }
  0x3e   : > { %626 = vmatmul.msk.bf16.vlgmr.msra.gmra.mxu0 %vm342_vm1, %v336_v6  ;;  %627 = vmatmul.msk.bf16.vlgmr.msra.gmra.mxu1 %vm342_vm1, %v336_v6  ;;  %p831_p0 = pnand %p830_p13, %p826_p8 }
  0x41   : > { %v379_v7 = vld.sshfl [vmem:[#allocation1] sm:$0xff pattern:$0x73625140]  ;;  %v380_v8 = vld.sshfl [vmem:[#allocation1 + $0x8] sm:$0xff pattern:$0x73625140] }
  0x42   : > { %v384_v9 = vsel %vm346_vm0, %v379_v7, 0  ;;  %v386_v10 = vsel %vm346_vm0, %v380_v8, 0 }
  0x43   : > { %395 = vmatpush.bf16.msra.mxu2 %v384_v9  ;;  %408 = vmatpush.bf16.msra.mxu3 %v386_v10 }
  0x46   : > { %628 = vmatmul.msk.bf16.vlgmr.msra.gmra.mxu2 %vm342_vm1, %v334_v11  ;;  %629 = vmatmul.msk.bf16.vlgmr.msra.gmra.mxu3 %vm342_vm1, %v334_v11 }
  0xbb   : > { %v360_v12 = vpop.f32.mrf.mxu0  ;;  %v373_v13 = vpop.f32.mrf.mxu1 }
  0xc3   : > { %v362_v14 = vpop.f32.mrf.mxu0  ;;  %v375_v15 = vpop.f32.mrf.mxu1 }
  0xc9   : > { %v397_v16 = vpop.f32.mrf.mxu2  ;;  %v410_v17 = vpop.f32.mrf.mxu3 }
  0xca   : > { %v398_v18 = vadd.f32 %v397_v16, %v360_v12  ;;  %v411_v19 = vadd.f32 %v410_v17, %v373_v13 }
  0xcc   : > { %v414_v20 = vmax.f32 %v398_v18, 0.0  ;;  %v415_v21 = vmax.f32 %v411_v19, 0.0 }
  0xce   : > { %v416_v22 = vpack.c.bf16 %v415_v21, %v414_v20  ;;  %v425_v23 = vsel %vm424_vm2, %v414_v20, 0.0  ;;  %v426_v24 = vsel %vm424_vm2, %v415_v21, 0.0 }
  0xcf   : > { %v427_v25 = vadd.f32 %v426_v24, %v425_v23 }
  0xd0   : > { %v418_v26 = vrot.slane %v416_v22, 2 }
  0xd1   : > { %v399_v27 = vpop.f32.mrf.mxu2  ;;  %v412_v28 = vpop.f32.mrf.mxu3  ;;  %428 = vadd.xlane.f32.xlu0 %v427_v25 }
  0xd2   : > { %v421_v29 = vsel %vm346_vm0, %v416_v22, %v418_v26 }
  0xd3   : > { %423 = vst [vmem:[%s319_s28] sm:$0xf] %v421_v29 }
  0xd4   : > { %834 = shalt.err (!%p831_p0)
}
  0xd5   : > { %646 = dma.vmem_to_hbm [thread:$0]  (%p1006_p5), %s461_s29, 64, %s463_s30, %s441_s7   ;;  %vm434_vm3 = vcmask 3072   ;;  %v900_v30 = vmov 0.0  }
  0xd6   : > { %p329_p3 = scmp.lt.s32.totalorder %s889_s21, 1 }
  0xd8   : > { %s1136_s21 = smov (!%p329_p3, %s889_s21), 1 }
  0xd9   : > { %s625_s11 = sshll.u32 %s1136_s21, 2 }
  0xda   : > { %s332_s6 = scalar_lea.vmem %s1108_s5, %s625_s11 }
  0xdb   : > { %435 = vst.msk [vmem:[%s332_s6] sm:$0xf] %vm434_vm3, %v900_v30 }
  0xe2   : > { %v436_v31 = vld [vmem:[%s332_s6] sm:$0xf] }
 0x144   : > { %v429_v32 = vpop.xlane.xlu0 %428 }
 0x145   : > { %v437_v33 = vadd.f32 %v436_v31, %v429_v32 }
 0x147   : > { %439 = vst.msk [vmem:[%s332_s6] sm:$0xf] %vm434_vm3, %v437_v33 }
 0x148 PF: > { %s1125_s26 = sld [smem:[#allocation13_spill]]  ;;  %p660_p5 = pnand %p613_p9, %p976_p6 }
 0x14a   : > { %p661_p7 = pneg %p660_p5 }
 0x14e   : > { %s477_s14 = sand.u32 1, %s1125_s26  }
 0x14f   : > { %s478_s21 = scalar_lea.sflag [#allocation4], %s477_s14 }
 0x150   : > { %872 = dma.done.wait (%p661_p7), %s478_s21, 64  }
 0x151   : > { %874 = vsyncadd (%p661_p7), %s478_s21, 4294967232  ;;  %s25_s23 = sadd.s32 1, %s897_s23   ;;  %s1127_s24 = sld [smem:[#allocation17_spill]] }
 0x152   : > { %p22_p10 = scmp.ge.s32.totalorder %s25_s23, 4   ;;  %s1128_s21 = sld [smem:[#allocation14_spill]] }
 0x153   : > { %s1129_s22 = sld [smem:[#allocation16_spill]]  ;;  %s1130_s18 = smov %s881_s19 }
 0x154   : > { %s1131_s19 = smov %s885_s20  ;;  %24 = sbr.rel (!%p22_p10) target bundleno = 10 (0xa), region = 114 }
 0x157   : > { %s1132_s20 = smov %s1127_s24 }
 0x159   :  { %491 = vsyncpa [#allocation3], 1 }
 0x15a   :  { %493 = vsyncpa [#allocation3 + $0x1], 1 }
 0x15b   :  { %494 = vsyncpa [#allocation6], 1 }
 0x15c   :  { %496 = vsyncpa [#allocation6 + $0x1], 1 }
 0x15d   :  { %497 = vsyncpa [#allocation4], 1 }
 0x15e   :  { %499 = vsyncpa [#allocation4 + $0x1], 1 }

</bundles_post_ra>
